<compile_context>
chip_gen: v5e
topology: v5e:2x2
jax: 0.10.0
libtpu: 0.0.40
codegen_flags: <defaults>
</compile_context>

<pallas_src>
import functools
import numpy as np

import jax
import jax.numpy as jnp
from jax.experimental import pallas as pl
from jax.experimental.pallas import tpu as pltpu

HIDDEN = 32  # self.hidden_size in the PyTorch module


def _round_up(x, m):
    return ((x + m - 1) // m) * m


def _seqs_per_block(B, T, max_lanes=4096):
    """Whole sequences per grid step (bounds per-step VMEM; keeps lanes dense).

    max_lanes=4096 fits comfortably in every generation's default scoped VMEM;
    on v6e it can be raised to 8-16K together with vmem_limit_bytes for a bit more
    per-step amortization.
    """
    bb = max(1, min(B, max_lanes // max(T, 1)))
    # v7x has 2 TensorCores: make sure the ("parallel",) grid axis has >= 2 steps
    # whenever there is more than one sequence to split.
    if B >= 2 and -(-B // bb) < 2:
        bb = -(-B // 2)
    return bb


def tcn_kernel(x_ref, w_in_ref, w_hid_ref, fc_ref, b_ref, o_ref, *, seq_len, bb, hidden):
    f32 = jnp.float32
    bf16 = jnp.bfloat16

    x = x_ref[0].astype(f32)          # (C_in, N): channels on sublanes, time-major lanes
    n = x.shape[1]
    bias = b_ref[...]                 # (2H, 8) f32 bias slab

    # Hoisted causal masks (built once per grid step).
    # Lane l <-> (t = l // bb, s = l % bb); the dilated tap x[t-d] is zero for t < d,
    # i.e. for lanes l < d*bb.
    lane = jax.lax.broadcasted_iota(jnp.int32, (1, n), 1)
    mask = {d: (lane >= d * bb).astype(f32) for d in (1, 2, 4)}

    def aug(h, d):
        # Causal dilated shift along lanes: cyclic roll by d*bb; any wrap-around lands
        # exactly in the masked (t < d) region.  Stack [x[t-d]; x[t]] on the channel
        # (sublane) axis so one bf16 MXU matmul fuses both conv taps.  Both halves are
        # C sublanes -> the concat is (8/16,128)-tile aligned (no ragged-operand copy).
        rolled = pltpu.roll(h, shift=(d * bb) % n, axis=1)
        return jnp.concatenate([rolled * mask[d], h], axis=0).astype(bf16)   # (2C, N)

    def conv(w, h_aug, b):
        # bf16 x bf16 -> f32 accumulate on the MXU, bias as a VPU broadcast add.
        return jnp.dot(w, h_aug, preferred_element_type=f32) + b

    # ---- block 0 (dilation 1): conv1 and the 1x1 downsample share one matmul ----------
    z0 = conv(w_in_ref[...], aug(x, 1), bias[:, 0:1])             # (2H, N)
    c1 = jnp.maximum(z0[0:hidden, :], 0.0)
    res0 = z0[hidden:2 * hidden, :]
    # dropout(p=0.2) is identity in eval mode
    c2 = jnp.maximum(conv(w_hid_ref[0], aug(c1, 1), bias[0:hidden, 1:2]), 0.0)
    y0 = jnp.maximum(c2 + res0, 0.0)

    # ---- block 1 (dilation 2, identity residual) ---------------------------------------
    c1 = jnp.maximum(conv(w_hid_ref[1], aug(y0, 2), bias[0:hidden, 2:3]), 0.0)
    c2 = jnp.maximum(conv(w_hid_ref[2], aug(c1, 2), bias[0:hidden, 3:4]), 0.0)
    y1 = jnp.maximum(c2 + y0, 0.0)

    # ---- block 2 (dilation 4, identity residual) ---------------------------------------
    c1 = jnp.maximum(conv(w_hid_ref[3], aug(y1, 4), bias[0:hidden, 4:5]), 0.0)
    c2 = jnp.maximum(conv(w_hid_ref[4], aug(c1, 4), bias[0:hidden, 5:6]), 0.0)
    y2 = jnp.maximum(c2 + y1, 0.0)

    # ---- FC head on the last time step only ---------------------------------------------
    # Time-major lanes make the last time step of every sequence one contiguous lane
    # window [(T-1)*bb, T*bb); no FC over all timesteps, no wasted HBM writeback.
    out_size = o_ref.shape[1]
    last = y2[:, (seq_len - 1) * bb:seq_len * bb].astype(bf16)    # (H, bb)
    out = jnp.dot(fc_ref[...], last, preferred_element_type=f32) + bias[0:out_size, 6:7]
    o_ref[0] = out.astype(o_ref.dtype)                            # (O, bb)


def init_params(key, input_size, output_size, hidden=HIDDEN):
    """Deterministic synthetic init in the packed layout the kernel consumes.

    weight_norm at PyTorch default init gives effective weight == v, and TCN.init_weights
    draws conv weights from N(0, 0.01); packed *effective* weights are built directly.
      w_in  : (2H, 2C)   rows [0:H) block-0 conv1, rows [H:2H) 1x1 downsample;
              cols [0:C) tap on x[t-d], cols [C:2C) tap on x[t]
              (downsample rows keep zeros in the shifted-tap columns).
      w_hid : (5, H, 2H) remaining five convs, same column layout.
      fc_w  : (O, H)
      b_slab: (2H, 8) f32: col 0 = [conv0 bias; downsample bias], cols 1..5 = hidden conv
              biases (rows [0:H)), col 6 = fc bias (rows [0:O)), col 7 = zeros.
    """
    assert output_size <= 2 * hidden, "fc bias must fit in the bias slab rows"
    k = jax.random.split(key, 8)
    c = input_size
    conv0_w = jax.random.normal(k[0], (hidden, 2 * c), jnp.float32) * 0.01
    ds_w = jax.random.normal(k[1], (hidden, c), jnp.float32) * 0.01
    w_in = jnp.concatenate(
        [conv0_w,
         jnp.concatenate([jnp.zeros((hidden, c), jnp.float32), ds_w], axis=1)],
        axis=0)                                                            # (2H, 2C)
    w_hid = jax.random.normal(k[2], (5, hidden, 2 * hidden), jnp.float32) * 0.01
    fc_w = jax.random.normal(k[3], (output_size, hidden), jnp.float32) * 0.1

    conv0_b = jax.random.normal(k[4], (hidden,), jnp.float32) * 0.01
    ds_b = jax.random.normal(k[5], (hidden,), jnp.float32) * 0.01
    b_hid = jax.random.normal(k[6], (5, hidden), jnp.float32) * 0.01
    fc_b = jax.random.normal(k[7], (output_size,), jnp.float32) * 0.1

    b_slab = jnp.zeros((2 * hidden, 8), jnp.float32)
    b_slab = b_slab.at[:, 0].set(jnp.concatenate([conv0_b, ds_b]))
    b_slab = b_slab.at[:hidden, 1:6].set(b_hid.T)
    b_slab = b_slab.at[:output_size, 6].set(fc_b)
    return (w_in, w_hid, fc_w, b_slab)


@functools.partial(jax.jit, static_argnames=("input_size", "output_size", "reshape_output"))
def spatial_ext_tcn_forward(x, params, *, input_size, output_size, reshape_output=False):
    w_in, w_hid, fc_w, b_slab = params
    B = x.shape[0]
    # PyTorch: x = torch.reshape(x, (batch_size, input_size, -1)) -> (B, C, T), raw reshape
    x_nct = jnp.reshape(x, (B, input_size, -1)).astype(jnp.float32)
    T = x_nct.shape[-1]

    bb = _seqs_per_block(B, T)                 # whole sequences per grid step
    nblk = -(-B // bb)
    b_pad = nblk * bb
    bbt = bb * T
    n_lanes = _round_up(bbt, 128)

    # Kernel layout: channels on sublanes; lanes are time-major within a block
    # (lane = t*bb + s), padded to a multiple of 128.  Input is cast to bf16 (dot
    # operand) which also halves the input HBM->VMEM DMA traffic.
    x_cbt = jnp.transpose(x_nct, (1, 0, 2))                          # (C, B, T)
    x_cbt = jnp.pad(x_cbt, ((0, 0), (0, b_pad - B), (0, 0)))         # (C, b_pad, T)
    xb = x_cbt.reshape(input_size, nblk, bb, T)
    xb = jnp.transpose(xb, (1, 0, 3, 2)).reshape(nblk, input_size, bbt)
    xb = jnp.pad(xb, ((0, 0), (0, 0), (0, n_lanes - bbt))).astype(jnp.bfloat16)

    w_in_bf = w_in.astype(jnp.bfloat16)
    w_hid_bf = w_hid.astype(jnp.bfloat16)
    fc_w_bf = fc_w.astype(jnp.bfloat16)

    kernel = functools.partial(tcn_kernel, seq_len=T, bb=bb, hidden=HIDDEN)

    out = pl.pallas_call(
        kernel,
        out_shape=jax.ShapeDtypeStruct((nblk, output_size, bb), jnp.float32),
        grid=(nblk,),
        in_specs=[
            pl.BlockSpec((1, input_size, n_lanes), lambda i: (i, 0, 0)),
            pl.BlockSpec(w_in_bf.shape, lambda i: (0, 0)),
            pl.BlockSpec(w_hid_bf.shape, lambda i: (0, 0, 0)),
            pl.BlockSpec(fc_w_bf.shape, lambda i: (0, 0)),
            pl.BlockSpec(b_slab.shape, lambda i: (0, 0)),
        ],
        out_specs=pl.BlockSpec((1, output_size, bb), lambda i: (i, 0, 0)),
        compiler_params=pltpu.CompilerParams(dimension_semantics=("parallel",)),
    )(xb, w_in_bf, w_hid_bf, fc_w_bf, b_slab)

    # (nblk, O, bb) -> (B, O): the kernel already selected tcn_out[:, :, -1] per sequence
    out = jnp.transpose(out, (0, 2, 1)).reshape(b_pad, output_size)[:B]
    if reshape_output and output_size == 1:
        out = jnp.squeeze(out, axis=1)
    return out


def reference_forward(x, params, *, input_size, output_size, hidden=HIDDEN):
    """Pure-JAX f32 reference with identical math, for a runtime sanity check."""
    P = jax.lax.Precision.HIGHEST
    w_in, w_hid, fc_w, b_slab = params
    B = x.shape[0]
    x_nct = jnp.reshape(x, (B, input_size, -1)).astype(jnp.float32)
    T = x_nct.shape[-1]
    h = jnp.transpose(x_nct, (0, 2, 1))  # (B, T, C)

    b_in = b_slab[:, 0]                    # (2H,)
    b_hid = b_slab[:hidden, 1:6].T         # (5, H)
    fc_b = b_slab[:output_size, 6]         # (O,)

    def shift(a, d):
        pad = jnp.zeros((B, d, a.shape[2]), a.dtype)
        return jnp.concatenate([pad, a[:, : T - d, :]], axis=1)

    def cconv(a, d, w, b):  # w: (C_out, 2C): [0:C) tap on x[t-d], [C:2C) tap on x[t]
        c = a.shape[2]
        return (jnp.einsum("btc,oc->bto", shift(a, d), w[:, :c], precision=P)
                + jnp.einsum("btc,oc->bto", a, w[:, c:], precision=P) + b)

    def block(a, d, w1, b1, w2, b2, res):
        o = jax.nn.relu(cconv(a, d, w1, b1))
        o = jax.nn.relu(cconv(o, d, w2, b2))
        return jax.nn.relu(o + res)

    c_in = input_size
    w0_1, b0_1 = w_in[:hidden], b_in[:hidden]
    w_ds, b_ds = w_in[hidden:], b_in[hidden:]
    res0 = jnp.einsum("btc,oc->bto", h, w_ds[:, c_in:], precision=P) + b_ds
    y0 = block(h, 1, w0_1, b0_1, w_hid[0], b_hid[0], res0)
    y1 = block(y0, 2, w_hid[1], b_hid[1], w_hid[2], b_hid[2], y0)
    y2 = block(y1, 4, w_hid[3], b_hid[3], w_hid[4], b_hid[4], y1)
    last = y2[:, -1, :]                                                  # (B, H)
    return jnp.dot(last, fc_w.T, precision=P) + fc_b                    # (B, O)


if __name__ == "__main__":
    key = jax.random.PRNGKey(0)
    k_x, k_p = jax.random.split(key)

    batch, seq, input_size, output_size = 2, 8, 16, 8
    # raw input (per-frame features); forward reshapes it to (B, input_size, -1) -> T = 8
    x = jax.random.normal(k_x, (batch, seq, input_size), jnp.float32)
    params = init_params(k_p, input_size, output_size)

    y = spatial_ext_tcn_forward(x, params, input_size=input_size, output_size=output_size)
    y = jax.block_until_ready(y)

    y_ref = reference_forward(x, params, input_size=input_size, output_size=output_size)
    assert y.shape == (batch, output_size)
    # bf16 MXU operands vs f32-HIGHEST reference -> loosened tolerance
    np.testing.assert_allclose(np.asarray(y), np.asarray(y_ref), rtol=2e-2, atol=2e-3)

    print("KERNEL_OK")
</pallas_src>

<mosaic_0001>
module attributes {stable_mosaic.version = 11 : i64} {
  func.func @tcn_kernel(%arg0: i32, %arg1: memref<1x16x128xbf16, #tpu.memory_space<vmem>>, %arg2: memref<64x32xbf16, #tpu.memory_space<vmem>>, %arg3: memref<5x32x64xbf16, #tpu.memory_space<vmem>>, %arg4: memref<8x32xbf16, #tpu.memory_space<vmem>>, %arg5: memref<64x8xf32, #tpu.memory_space<vmem>>, %arg6: memref<1x8x1xf32, #tpu.memory_space<vmem>>) attributes {dimension_semantics = [#tpu.dimension_semantics<parallel>], iteration_bounds = array<i64: 2>, scalar_prefetch = 0 : i64, scratch_operands = 0 : i64, tpu.core_type = #tpu.core_type<tc>, window_params = [{transform_indices = @transform_0, window_bounds = array<i64: 1, 16, 128>}, {pipeline_mode = #tpu.pipeline_mode<synchronous>, transform_indices = @transform_1, window_bounds = array<i64: 64, 32>}, {pipeline_mode = #tpu.pipeline_mode<synchronous>, transform_indices = @transform_2, window_bounds = array<i64: 5, 32, 64>}, {pipeline_mode = #tpu.pipeline_mode<synchronous>, transform_indices = @transform_3, window_bounds = array<i64: 8, 32>}, {pipeline_mode = #tpu.pipeline_mode<synchronous>, transform_indices = @transform_4, window_bounds = array<i64: 64, 8>}, {transform_indices = @transform_5, window_bounds = array<i64: 1, 8, 1>}]} {
    %c0 = arith.constant 0 : index
    %c0_0 = arith.constant 0 : index
    %c0_1 = arith.constant 0 : index
    %0 = vector.load %arg1[%c0, %c0_0, %c0_1] : memref<1x16x128xbf16, #tpu.memory_space<vmem>>, vector<1x16x128xbf16>
    %1 = vector.shape_cast %0 : vector<1x16x128xbf16> to vector<16x128xbf16>
    %2 = arith.extf %1 : vector<16x128xbf16> to vector<16x128xf32>
    %c0_2 = arith.constant 0 : index
    %c0_3 = arith.constant 0 : index
    %3 = vector.load %arg5[%c0_2, %c0_3] : memref<64x8xf32, #tpu.memory_space<vmem>>, vector<64x8xf32>
    %4 = tpu.iota {dimensions = array<i32: 1>} : vector<1x128xi32>
    %c1_i32 = arith.constant 1 : i32
    %5 = vector.broadcast %c1_i32 : i32 to vector<1x128xi32>
    %6 = arith.cmpi sge, %4, %5 : vector<1x128xi32>
    %7 = arith.extui %6 : vector<1x128xi1> to vector<1x128xi32>
    %8 = arith.sitofp %7 : vector<1x128xi32> to vector<1x128xf32>
    %c2_i32 = arith.constant 2 : i32
    %9 = vector.broadcast %c2_i32 : i32 to vector<1x128xi32>
    %10 = arith.cmpi sge, %4, %9 : vector<1x128xi32>
    %11 = arith.extui %10 : vector<1x128xi1> to vector<1x128xi32>
    %12 = arith.sitofp %11 : vector<1x128xi32> to vector<1x128xf32>
    %c4_i32 = arith.constant 4 : i32
    %13 = vector.broadcast %c4_i32 : i32 to vector<1x128xi32>
    %14 = arith.cmpi sge, %4, %13 : vector<1x128xi32>
    %15 = arith.extui %14 : vector<1x128xi1> to vector<1x128xi32>
    %16 = arith.sitofp %15 : vector<1x128xi32> to vector<1x128xf32>
    %c0_4 = arith.constant 0 : index
    %c0_5 = arith.constant 0 : index
    %17 = vector.load %arg2[%c0_4, %c0_5] : memref<64x32xbf16, #tpu.memory_space<vmem>>, vector<64x32xbf16>
    %c1_i32_6 = arith.constant 1 : i32
    %18 = tpu.dynamic_rotate %2 by %c1_i32_6 dim 1 : vector<16x128xf32>, i32 -> vector<16x128xf32>
    %19 = vector.broadcast %8 : vector<1x128xf32> to vector<16x128xf32>
    %20 = arith.mulf %18, %19 : vector<16x128xf32>
    %21 = tpu.concatenate %20, %2 in 0 : vector<16x128xf32>, vector<16x128xf32> -> vector<32x128xf32>
    %22 = arith.truncf %21 : vector<32x128xf32> to vector<32x128xbf16>
    %23 = vector.extract_strided_slice %3 {offsets = [0, 0], sizes = [64, 1], strides = [1, 1]} : vector<64x8xf32> to vector<64x1xf32>
    %cst = arith.constant dense<0.000000e+00> : vector<64x128xf32>
    %24 = tpu.matmul %17, %22, %cst {dimension_numbers = #tpu.dot_dimension_numbers<[1], [0], [0], [1], [0, 0, 1, 1], [], []>} : vector<64x32xbf16>, vector<32x128xbf16>, vector<64x128xf32> -> vector<64x128xf32>
    %25 = vector.broadcast %23 : vector<64x1xf32> to vector<64x128xf32>
    %26 = arith.addf %24, %25 : vector<64x128xf32>
    %27 = vector.extract_strided_slice %26 {offsets = [0, 0], sizes = [32, 128], strides = [1, 1]} : vector<64x128xf32> to vector<32x128xf32>
    %cst_7 = arith.constant 0.000000e+00 : f32
    %28 = vector.broadcast %cst_7 : f32 to vector<32x128xf32>
    %29 = arith.maximumf %27, %28 : vector<32x128xf32>
    %30 = vector.extract_strided_slice %26 {offsets = [32, 0], sizes = [32, 128], strides = [1, 1]} : vector<64x128xf32> to vector<32x128xf32>
    %c0_8 = arith.constant 0 : index
    %c0_9 = arith.constant 0 : index
    %c0_10 = arith.constant 0 : index
    %31 = vector.load %arg3[%c0_8, %c0_9, %c0_10] : memref<5x32x64xbf16, #tpu.memory_space<vmem>>, vector<1x32x64xbf16>
    %32 = vector.shape_cast %31 : vector<1x32x64xbf16> to vector<32x64xbf16>
    %c1_i32_11 = arith.constant 1 : i32
    %33 = tpu.dynamic_rotate %29 by %c1_i32_11 dim 1 : vector<32x128xf32>, i32 -> vector<32x128xf32>
    %34 = vector.broadcast %8 : vector<1x128xf32> to vector<32x128xf32>
    %35 = arith.mulf %33, %34 : vector<32x128xf32>
    %36 = tpu.concatenate %35, %29 in 0 : vector<32x128xf32>, vector<32x128xf32> -> vector<64x128xf32>
    %37 = arith.truncf %36 : vector<64x128xf32> to vector<64x128xbf16>
    %38 = vector.extract_strided_slice %3 {offsets = [0, 1], sizes = [32, 1], strides = [1, 1]} : vector<64x8xf32> to vector<32x1xf32>
    %cst_12 = arith.constant dense<0.000000e+00> : vector<32x128xf32>
    %39 = tpu.matmul %32, %37, %cst_12 {dimension_numbers = #tpu.dot_dimension_numbers<[1], [0], [0], [1], [0, 0, 1, 1], [], []>} : vector<32x64xbf16>, vector<64x128xbf16>, vector<32x128xf32> -> vector<32x128xf32>
    %40 = vector.broadcast %38 : vector<32x1xf32> to vector<32x128xf32>
    %41 = arith.addf %39, %40 : vector<32x128xf32>
    %cst_13 = arith.constant 0.000000e+00 : f32
    %42 = vector.broadcast %cst_13 : f32 to vector<32x128xf32>
    %43 = arith.maximumf %41, %42 : vector<32x128xf32>
    %44 = arith.addf %43, %30 : vector<32x128xf32>
    %cst_14 = arith.constant 0.000000e+00 : f32
    %45 = vector.broadcast %cst_14 : f32 to vector<32x128xf32>
    %46 = arith.maximumf %44, %45 : vector<32x128xf32>
    %c1 = arith.constant 1 : index
    %c0_15 = arith.constant 0 : index
    %c0_16 = arith.constant 0 : index
    %47 = vector.load %arg3[%c1, %c0_15, %c0_16] : memref<5x32x64xbf16, #tpu.memory_space<vmem>>, vector<1x32x64xbf16>
    %48 = vector.shape_cast %47 : vector<1x32x64xbf16> to vector<32x64xbf16>
    %c2_i32_17 = arith.constant 2 : i32
    %49 = tpu.dynamic_rotate %46 by %c2_i32_17 dim 1 : vector<32x128xf32>, i32 -> vector<32x128xf32>
    %50 = vector.broadcast %12 : vector<1x128xf32> to vector<32x128xf32>
    %51 = arith.mulf %49, %50 : vector<32x128xf32>
    %52 = tpu.concatenate %51, %46 in 0 : vector<32x128xf32>, vector<32x128xf32> -> vector<64x128xf32>
    %53 = arith.truncf %52 : vector<64x128xf32> to vector<64x128xbf16>
    %54 = vector.extract_strided_slice %3 {offsets = [0, 2], sizes = [32, 1], strides = [1, 1]} : vector<64x8xf32> to vector<32x1xf32>
    %cst_18 = arith.constant dense<0.000000e+00> : vector<32x128xf32>
    %55 = tpu.matmul %48, %53, %cst_18 {dimension_numbers = #tpu.dot_dimension_numbers<[1], [0], [0], [1], [0, 0, 1, 1], [], []>} : vector<32x64xbf16>, vector<64x128xbf16>, vector<32x128xf32> -> vector<32x128xf32>
    %56 = vector.broadcast %54 : vector<32x1xf32> to vector<32x128xf32>
    %57 = arith.addf %55, %56 : vector<32x128xf32>
    %cst_19 = arith.constant 0.000000e+00 : f32
    %58 = vector.broadcast %cst_19 : f32 to vector<32x128xf32>
    %59 = arith.maximumf %57, %58 : vector<32x128xf32>
    %c2 = arith.constant 2 : index
    %c0_20 = arith.constant 0 : index
    %c0_21 = arith.constant 0 : index
    %60 = vector.load %arg3[%c2, %c0_20, %c0_21] : memref<5x32x64xbf16, #tpu.memory_space<vmem>>, vector<1x32x64xbf16>
    %61 = vector.shape_cast %60 : vector<1x32x64xbf16> to vector<32x64xbf16>
    %c2_i32_22 = arith.constant 2 : i32
    %62 = tpu.dynamic_rotate %59 by %c2_i32_22 dim 1 : vector<32x128xf32>, i32 -> vector<32x128xf32>
    %63 = vector.broadcast %12 : vector<1x128xf32> to vector<32x128xf32>
    %64 = arith.mulf %62, %63 : vector<32x128xf32>
    %65 = tpu.concatenate %64, %59 in 0 : vector<32x128xf32>, vector<32x128xf32> -> vector<64x128xf32>
    %66 = arith.truncf %65 : vector<64x128xf32> to vector<64x128xbf16>
    %67 = vector.extract_strided_slice %3 {offsets = [0, 3], sizes = [32, 1], strides = [1, 1]} : vector<64x8xf32> to vector<32x1xf32>
    %cst_23 = arith.constant dense<0.000000e+00> : vector<32x128xf32>
    %68 = tpu.matmul %61, %66, %cst_23 {dimension_numbers = #tpu.dot_dimension_numbers<[1], [0], [0], [1], [0, 0, 1, 1], [], []>} : vector<32x64xbf16>, vector<64x128xbf16>, vector<32x128xf32> -> vector<32x128xf32>
    %69 = vector.broadcast %67 : vector<32x1xf32> to vector<32x128xf32>
    %70 = arith.addf %68, %69 : vector<32x128xf32>
    %cst_24 = arith.constant 0.000000e+00 : f32
    %71 = vector.broadcast %cst_24 : f32 to vector<32x128xf32>
    %72 = arith.maximumf %70, %71 : vector<32x128xf32>
    %73 = arith.addf %72, %46 : vector<32x128xf32>
    %cst_25 = arith.constant 0.000000e+00 : f32
    %74 = vector.broadcast %cst_25 : f32 to vector<32x128xf32>
    %75 = arith.maximumf %73, %74 : vector<32x128xf32>
    %c3 = arith.constant 3 : index
    %c0_26 = arith.constant 0 : index
    %c0_27 = arith.constant 0 : index
    %76 = vector.load %arg3[%c3, %c0_26, %c0_27] : memref<5x32x64xbf16, #tpu.memory_space<vmem>>, vector<1x32x64xbf16>
    %77 = vector.shape_cast %76 : vector<1x32x64xbf16> to vector<32x64xbf16>
    %c4_i32_28 = arith.constant 4 : i32
    %78 = tpu.dynamic_rotate %75 by %c4_i32_28 dim 1 : vector<32x128xf32>, i32 -> vector<32x128xf32>
    %79 = vector.broadcast %16 : vector<1x128xf32> to vector<32x128xf32>
    %80 = arith.mulf %78, %79 : vector<32x128xf32>
    %81 = tpu.concatenate %80, %75 in 0 : vector<32x128xf32>, vector<32x128xf32> -> vector<64x128xf32>
    %82 = arith.truncf %81 : vector<64x128xf32> to vector<64x128xbf16>
    %83 = vector.extract_strided_slice %3 {offsets = [0, 4], sizes = [32, 1], strides = [1, 1]} : vector<64x8xf32> to vector<32x1xf32>
    %cst_29 = arith.constant dense<0.000000e+00> : vector<32x128xf32>
    %84 = tpu.matmul %77, %82, %cst_29 {dimension_numbers = #tpu.dot_dimension_numbers<[1], [0], [0], [1], [0, 0, 1, 1], [], []>} : vector<32x64xbf16>, vector<64x128xbf16>, vector<32x128xf32> -> vector<32x128xf32>
    %85 = vector.broadcast %83 : vector<32x1xf32> to vector<32x128xf32>
    %86 = arith.addf %84, %85 : vector<32x128xf32>
    %cst_30 = arith.constant 0.000000e+00 : f32
    %87 = vector.broadcast %cst_30 : f32 to vector<32x128xf32>
    %88 = arith.maximumf %86, %87 : vector<32x128xf32>
    %c4 = arith.constant 4 : index
    %c0_31 = arith.constant 0 : index
    %c0_32 = arith.constant 0 : index
    %89 = vector.load %arg3[%c4, %c0_31, %c0_32] : memref<5x32x64xbf16, #tpu.memory_space<vmem>>, vector<1x32x64xbf16>
    %90 = vector.shape_cast %89 : vector<1x32x64xbf16> to vector<32x64xbf16>
    %c4_i32_33 = arith.constant 4 : i32
    %91 = tpu.dynamic_rotate %88 by %c4_i32_33 dim 1 : vector<32x128xf32>, i32 -> vector<32x128xf32>
    %92 = vector.broadcast %16 : vector<1x128xf32> to vector<32x128xf32>
    %93 = arith.mulf %91, %92 : vector<32x128xf32>
    %94 = tpu.concatenate %93, %88 in 0 : vector<32x128xf32>, vector<32x128xf32> -> vector<64x128xf32>
    %95 = arith.truncf %94 : vector<64x128xf32> to vector<64x128xbf16>
    %96 = vector.extract_strided_slice %3 {offsets = [0, 5], sizes = [32, 1], strides = [1, 1]} : vector<64x8xf32> to vector<32x1xf32>
    %cst_34 = arith.constant dense<0.000000e+00> : vector<32x128xf32>
    %97 = tpu.matmul %90, %95, %cst_34 {dimension_numbers = #tpu.dot_dimension_numbers<[1], [0], [0], [1], [0, 0, 1, 1], [], []>} : vector<32x64xbf16>, vector<64x128xbf16>, vector<32x128xf32> -> vector<32x128xf32>
    %98 = vector.broadcast %96 : vector<32x1xf32> to vector<32x128xf32>
    %99 = arith.addf %97, %98 : vector<32x128xf32>
    %cst_35 = arith.constant 0.000000e+00 : f32
    %100 = vector.broadcast %cst_35 : f32 to vector<32x128xf32>
    %101 = arith.maximumf %99, %100 : vector<32x128xf32>
    %102 = arith.addf %101, %75 : vector<32x128xf32>
    %cst_36 = arith.constant 0.000000e+00 : f32
    %103 = vector.broadcast %cst_36 : f32 to vector<32x128xf32>
    %104 = arith.maximumf %102, %103 : vector<32x128xf32>
    %105 = vector.extract_strided_slice %104 {offsets = [0, 7], sizes = [32, 1], strides = [1, 1]} : vector<32x128xf32> to vector<32x1xf32>
    %106 = arith.truncf %105 : vector<32x1xf32> to vector<32x1xbf16>
    %c0_37 = arith.constant 0 : index
    %c0_38 = arith.constant 0 : index
    %107 = vector.load %arg4[%c0_37, %c0_38] : memref<8x32xbf16, #tpu.memory_space<vmem>>, vector<8x32xbf16>
    %cst_39 = arith.constant dense<0.000000e+00> : vector<8x1xf32>
    %108 = tpu.matmul %107, %106, %cst_39 {dimension_numbers = #tpu.dot_dimension_numbers<[1], [0], [0], [1], [0, 0, 1, 1], [], []>} : vector<8x32xbf16>, vector<32x1xbf16>, vector<8x1xf32> -> vector<8x1xf32>
    %109 = vector.extract_strided_slice %3 {offsets = [0, 6], sizes = [8, 1], strides = [1, 1]} : vector<64x8xf32> to vector<8x1xf32>
    %110 = arith.addf %108, %109 : vector<8x1xf32>
    %c0_40 = arith.constant 0 : index
    %c0_41 = arith.constant 0 : index
    %c0_42 = arith.constant 0 : index
    %111 = vector.load %arg6[%c0_40, %c0_41, %c0_42] : memref<1x8x1xf32, #tpu.memory_space<vmem>>, vector<1x8x1xf32>
    %112 = vector.shape_cast %111 : vector<1x8x1xf32> to vector<8x1xf32>
    %113 = vector.shape_cast %110 : vector<8x1xf32> to vector<1x8x1xf32>
    tpu.vector_store %arg6[%c0_40, %c0_41, %c0_42], %113 {strides = array<i32>} : memref<1x8x1xf32, #tpu.memory_space<vmem>>, vector<1x8x1xf32>,
    return
  }
  func.func @transform_0(%arg0: i32) -> (i32, i32, i32) {
    %c0_i32 = arith.constant 0 : i32
    %c0_i32_0 = arith.constant 0 : i32
    %c0_i32_1 = arith.constant 0 : i32
    return %arg0, %c0_i32, %c0_i32_0 : i32, i32, i32
  }
  func.func @transform_1(%arg0: i32) -> (i32, i32) {
    %c0_i32 = arith.constant 0 : i32
    %c0_i32_0 = arith.constant 0 : i32
    %c0_i32_1 = arith.constant 0 : i32
    return %c0_i32, %c0_i32_0 : i32, i32
  }
  func.func @transform_2(%arg0: i32) -> (i32, i32, i32) {
    %c0_i32 = arith.constant 0 : i32
    %c0_i32_0 = arith.constant 0 : i32
    %c0_i32_1 = arith.constant 0 : i32
    %c0_i32_2 = arith.constant 0 : i32
    return %c0_i32, %c0_i32_0, %c0_i32_1 : i32, i32, i32
  }
  func.func @transform_3(%arg0: i32) -> (i32, i32) {
    %c0_i32 = arith.constant 0 : i32
    %c0_i32_0 = arith.constant 0 : i32
    %c0_i32_1 = arith.constant 0 : i32
    return %c0_i32, %c0_i32_0 : i32, i32
  }
  func.func @transform_4(%arg0: i32) -> (i32, i32) {
    %c0_i32 = arith.constant 0 : i32
    %c0_i32_0 = arith.constant 0 : i32
    %c0_i32_1 = arith.constant 0 : i32
    return %c0_i32, %c0_i32_0 : i32, i32
  }
  func.func @transform_5(%arg0: i32) -> (i32, i32, i32) {
    %c0_i32 = arith.constant 0 : i32
    %c0_i32_0 = arith.constant 0 : i32
    %c0_i32_1 = arith.constant 0 : i32
    return %arg0, %c0_i32, %c0_i32_0 : i32, i32, i32
  }
}

</mosaic_0001>

<bundles_post_ra>
// kernel: spatial_ext_tcn_forward.1
= control target key start
LH: loop header
LB: loop body
LE: loop exit
PB: predicated region body
PF: predicated region fallthrough
CT: control target
= control target key end

     0   :  { %s1072_s18 = smov 0   ;;  %s1295_s0 = inlined_call_operand.vmem [shape: bf16[2,16,128], index: 0, kind: input, shape index: {}]   ;;  %s1296_s1 = inlined_call_operand.vmem [shape: bf16[64,32], index: 1, kind: input, shape index: {}]   ;;  %s1297_s2 = inlined_call_operand.vmem [shape: bf16[5,32,64], index: 2, kind: input, shape index: {}]   ;;  %s1298_s3 = inlined_call_operand.vmem [shape: bf16[8,32], index: 3, kind: input, shape index: {}]   ;;  %s1299_s4 = inlined_call_operand.vmem [shape: f32[64,8], index: 4, kind: input, shape index: {}]   ;;  %s1300_s5 = inlined_call_operand.vmem [shape: f32[2,8,1], index: 5, kind: output, shape index: {}]  }
   0x1 LB: > { %s858_s19 = sadd.s32 4294967295, %s1028_s18   ;;  %p862_p0 = scmp.ge.s32.totalorder %s1028_s18, 1  ;;  %s1028_s18 = sphi %s1072_s18, %s15_s18  }
   0x2   : > { %p187_p1 = scmp.lt.s32.totalorder %s1028_s18, 3 }
   0x4   : > { %p188_p2 = pnand %p862_p0, %p187_p1 }
   0x5   : > { %p214_p3 = scmp.lt.s32.totalorder (!%p188_p2), %s858_s19, 1  ;;  %s1030_s24 = smov (!%p188_p2), 1  }
   0x6   : > { %191 = sbr.rel (%p188_p2) target bundleno = 1975 (0x7b7), region = 40  ;;  %s1034_s6 = smov (!%p188_p2), 2  }
   0x7   : > { %s1037_s15 = smov (!%p188_p2), 4   ;;  %s1040_s27 = smov (!%p188_p2), 121  }
   0x8   : > { %s1041_s28 = smov (!%p188_p2), 122  }
   0xb   : > { %s1302_s19 = smov (!%p214_p3, %s858_s19), 1  ;;  %v1092_v4 = vld [vmem:[%s1299_s4 + $0x18] sm:$0xff]  ;;  %v1031_v5 = vmov 0   ;;  %v1101_v6 = vld [vmem:[%s1299_s4] sm:$0xff]  ;;  %v236_v7 = vlaneseq  ;;  %v1109_v9 = vld [vmem:[%s1299_s4 + $0x10] sm:$0xff]  ;;  %v1032_v12 = vmov 0.0  }
   0xc   : > { %s958_s20 = sshll.u32 %s1302_s19, 3  ;;  %1003 = vset.pattern.permute.xlu1 %v1031_v5  ;;  %1002 = vset.pattern.permute.xlu0 %v1031_v5  ;;  %v1114_v10 = vld [vmem:[%s1299_s4 + $0x8] sm:$0xff]  ;;  %v959_v19 = vld [vmem:[%s1296_s1] sm:$0xff]  ;;  %vm323_vm1 = vcmask 261120   ;;  %v961_v21 = vld [vmem:[%s1296_s1 + $0x10] sm:$0xff]  ;;  %v1033_v42 = vmov 1  }
   0xd   : > { %s218_s23 = scalar_lea.vmem %s1295_s0, %s958_s20  ;;  %280 = vperm.xlu1 %1003, %v1092_v4   ;;  %1004 = vset.pattern.permute.xlu2 %v1031_v5  ;;  %v1104_v8 = vand.u32 127, %v236_v7  ;;  %v960_v20 = vld [vmem:[%s1296_s1 + $0x8] sm:$0xff]  ;;  %v962_v22 = vld [vmem:[%s1296_s1 + $0x18] sm:$0xff]  ;;  %v234_v32 = vld [vmem:[%s1299_s4 + $0x30] sm:$0xff]  ;;  %vm415_vm2 = vcmask 523264   ;;  %s222_s8 = scalar_lea.vmem %s1300_s5, %s958_s20  ;;  %vm803_vm5 = vcmask 7168  }
   0xe   : > { %v974_v0 = vld [vmem:[%s218_s23] sm:$0xff]   ;;  %270 = vperm.xlu2 %1004, %v1114_v10   ;;  %v235_v43 = vld [vmem:[%s1299_s4 + $0x38] sm:$0xff]  ;;  %v233_v46 = vld [vmem:[%s1299_s4 + $0x28] sm:$0xff] }
   0xf   : > { %v975_v1 = vunpack.c.l.bf16 %v974_v0  ;;  %v976_v2 = vunpack.c.h.bf16 %v974_v0  ;;  %342 = vmatpush.bf16.msra.mxu0 %v974_v0  ;;  %vm238_vm0 = vcmp.ge.s32.totalorder %v1104_v8, 1  ;;  %v232_v44 = vld [vmem:[%s1299_s4 + $0x20] sm:$0xff]  ;;  %v964_v57 = vld [vmem:[%s1297_s2 + $0x8] sm:$0xff]  ;;  %vm241_vm3 = vcmp.ge.s32.totalorder %v1104_v8, 2 }
  0x10   : > { %v1120_v13 = vsel %vm238_vm0, 1.0, %v1032_v12  ;;  %v963_v56 = vld [vmem:[%s1297_s2] sm:$0xff]  ;;  %vm244_vm4 = vcmp.ge.s32.totalorder %v1104_v8, 4  ;;  %v970_v8 = vld [vmem:[%s1297_s2 + $0x38] sm:$0xff] }
  0x11   : > { %v997_v3 = vpack.i.bf16 %v976_v2, %v975_v1 }
  0x13   : > { %998 = vrot.lane.b32.xlu0 %v997_v3, %s1030_s24 }
  0x15   : > { %265 = vperm.xlu1 %1003, %v1101_v6  }
  0x16   : > { %1006 = vset.pattern.permute.xlu2 %v1033_v42 }
  0x1b   : > { %275 = vperm.xlu0 %1002, %v1109_v9  }
  0x1d   : > { %1005 = vset.pattern.permute.xlu1 %v1033_v42 }
  0x68   : > { %v271_v24 = vpop.permute.xlu2 %270 }
  0x7f   : > { %v281_v27 = vpop.permute.xlu1 %280 }
  0x85   : > { %v999_v11 = vpop.permute.xlu0 %998 }
  0x86   : > { %v1001_v14 = vunpack.i.h.bf16 %v999_v11  ;;  %v1000_v15 = vunpack.i.l.bf16 %v999_v11 }
  0x87   : > { %v266_v34 = vpop.permute.xlu1 %265 }
  0x88   : > { %v259_v16 = vmul.f32 %v1000_v15, %v1120_v13  ;;  %v260_v17 = vmul.f32 %v1001_v14, %v1120_v13 }
  0x8a   : > { %v261_v18 = vpack.c.bf16 %v260_v17, %v259_v16 }
  0x8c   : > { %343 = vmatpush.bf16.msra.mxu0 %v261_v18 }
  0x8d   : > { %v276_v29 = vpop.permute.xlu0 %275 }
  0x8f   : > { %885 = vmatmul.msk.bf16.vlgmr.msra.gmra.mxu0 %vm323_vm1, %v959_v19 }
  0x9f   : > { %886 = vmatmul.msk.bf16.gmra.mxu0 %vm323_vm1, %v960_v20 }
  0xaf   : > { %887 = vmatmul.msk.bf16.gmra.mxu0 %vm323_vm1, %v961_v21 }
  0xbf   : > { %888 = vmatmul.msk.bf16.gmra.mxu0 %vm323_vm1, %v962_v22 }
 0x10c   : > { %v345_v23 = vpop.f32.mrf.mxu0 }
 0x10d   : > { %v346_v35 = vadd.f32 %v345_v23, %v266_v34 }
 0x10f   : > { %v365_v38 = vmax.f32 %v346_v35, 0.0 }
 0x114   : > { %v347_v25 = vpop.f32.mrf.mxu0 }
 0x115   : > { %v348_v26 = vadd.f32 %v347_v25, %v271_v24 }
 0x117   : > { %v366_v28 = vmax.f32 %v348_v26, 0.0 }
 0x119   : > { %375 = vrot.lane.b32.xlu0 %v366_v28, %s1030_s24  ;;  %v387_v41 = vpack.c.bf16 %v366_v28, %v365_v38 }
 0x11c   : > { %v350_v30 = vpop.f32.mrf.mxu0 }
 0x11d   : > { %v351_v31 = vadd.f32 %v350_v30, %v276_v29 }
 0x11f   : > { %v367_v33 = vmax.f32 %v351_v31, 0.0 }
 0x121   : > { %377 = vrot.lane.b32.xlu2 %v367_v33, %s1030_s24  ;;  %295 = vperm.xlu0 %1002, %v234_v32  }
 0x124   : > { %v352_v36 = vpop.f32.mrf.mxu0 }
 0x125   : > { %v353_v37 = vadd.f32 %v352_v36, %v281_v27 }
 0x127   : > { %v368_v39 = vmax.f32 %v353_v37, 0.0 }
 0x129   : > { %379 = vrot.lane.b32.xlu1 %v368_v39, %s1030_s24  ;;  %373 = vrot.lane.b32.xlu2 %v365_v38, %s1030_s24  ;;  %v388_v40 = vpack.c.bf16 %v368_v39, %v367_v33  ;;  %v1035_v38 = vmov 2   ;;  %v867_v39 = vsel %vm241_vm3, 1.0, %v1032_v12 }
 0x12a   : > { %1008 = vset.pattern.permute.xlu0 %v1033_v42 }
 0x12b   : > { %426 = vmatpush.bf16.msra.mxu1 %v388_v40  ;;  %394 = vperm.xlu0 %1008, %v1114_v10  }
 0x12c   : > { %v355_v61 = vpop.f32.mrf.mxu0 }
 0x12f   : > { %427 = vmatpush.bf16.msra.mxu1 %v387_v41 }
 0x131   : > { %398 = vperm.xlu1 %1005, %v1109_v9   ;;  %402 = vperm.xlu2 %1006, %v1092_v4  }
 0x133   : > { %1011 = vset.pattern.permute.xlu0 %v1035_v38 }
 0x139   : > { %1007 = vset.pattern.permute.xlu1 %v1031_v5  ;;  %390 = vperm.xlu2 %1006, %v1101_v6  }
 0x13a   : > { %300 = vperm.xlu1 %1007, %v235_v43  }
 0x141   : > { %1009 = vset.pattern.permute.xlu2 %v1031_v5  ;;  %v357_v5 = vpop.f32.mrf.mxu0 }
 0x142   : > { %285 = vperm.xlu1 %1007, %v232_v44   ;;  %290 = vperm.xlu2 %1009, %v233_v46  }
 0x149   : > { %v360_v15 = vpop.f32.mrf.mxu0 }
 0x14a   : > { %1012 = vset.pattern.permute.xlu1 %v1035_v38  ;;  %1010 = vset.pattern.permute.xlu2 %v1035_v38 }
 0x151   : > { %v362_v26 = vpop.f32.mrf.mxu0 }
 0x17b   : > { %v378_v45 = vpop.permute.xlu2 %377 }
 0x17c   : > { %v383_v49 = vmul.f32 %v1120_v13, %v378_v45 }
 0x183   : > { %v374_v51 = vpop.permute.xlu2 %373 }
 0x184   : > { %v381_v54 = vmul.f32 %v1120_v13, %v374_v51  ;;  %v966_v51 = vld [vmem:[%s1297_s2 + $0x18] sm:$0xff] }
 0x18b   : > { %v376_v47 = vpop.permute.xlu0 %375  ;;  %v403_v60 = vpop.permute.xlu2 %402 }
 0x18c   : > { %v382_v52 = vmul.f32 %v1120_v13, %v376_v47 }
 0x18e   : > { %v385_v55 = vpack.c.bf16 %v382_v52, %v381_v54 }
 0x193   : > { %v391_v63 = vpop.permute.xlu2 %390 }
 0x19b   : > { %v380_v48 = vpop.permute.xlu1 %379 }
 0x19c   : > { %v384_v50 = vmul.f32 %v1120_v13, %v380_v48  ;;  %v296_v13 = vpop.permute.xlu0 %295  ;;  %v291_v23 = vpop.permute.xlu2 %290 }
 0x19d   : > { %v361_v19 = vadd.f32 %v360_v15, %v296_v13  ;;  %v358_v28 = vadd.f32 %v357_v5, %v291_v23  ;;  %v1036_v13 = vmov 3  }
 0x19e   : > { %v386_v53 = vpack.c.bf16 %v384_v50, %v383_v49  ;;  %v965_v50 = vld [vmem:[%s1297_s2 + $0x10] sm:$0xff] }
 0x1a0   : > { %428 = vmatpush.bf16.msra.mxu1 %v386_v53 }
 0x1a3   : > { %v399_v58 = vpop.permute.xlu1 %398 }
 0x1a4   : > { %429 = vmatpush.bf16.msra.mxu1 %v385_v55  ;;  %v395_v16 = vpop.permute.xlu0 %394 }
 0x1a7   : > { %897 = vmatmul.msk.bf16.vlgmr.msra.gmra.mxu1 %vm415_vm2, %v963_v56 }
 0x1ac   : > { %v301_v59 = vpop.permute.xlu1 %300 }
 0x1ad   : > { %v363_v31 = vadd.f32 %v362_v26, %v301_v59  ;;  %v968_v26 = vld [vmem:[%s1297_s2 + $0x28] sm:$0xff] }
 0x1b4   : > { %v286_v62 = vpop.permute.xlu1 %285 }
 0x1b5   : > { %v356_v2 = vadd.f32 %v355_v61, %v286_v62 }
 0x1b7   : > { %898 = vmatmul.msk.bf16.gmra.mxu1 %vm415_vm2, %v964_v57 }
 0x224   : > { %v431_v0 = vpop.f32.mrf.mxu1 }
 0x225   : > { %v432_v1 = vadd.f32 %v431_v0, %v391_v63 }
 0x227   : > { %v441_v3 = vmax.f32 %v432_v1, 0.0 }
 0x229   : > { %v445_v7 = vadd.f32 %v441_v3, %v356_v2 }
 0x22b   : > { %v1174_v11 = vmax.f32 %v445_v7, 0.0 }
 0x22c   : > { %v433_v14 = vpop.f32.mrf.mxu1 }
 0x22d   : > { %458 = vrot.lane.b32.xlu0 %v1174_v11, %s1034_s6  ;;  %v434_v20 = vadd.f32 %v433_v14, %v395_v16 }
 0x22f   : > { %v442_v24 = vmax.f32 %v434_v20, 0.0 }
 0x231   : > { %v446_v30 = vadd.f32 %v442_v24, %v358_v28  ;;  %v967_v24 = vld [vmem:[%s1297_s2 + $0x20] sm:$0xff] }
 0x233   : > { %v1182_v34 = vmax.f32 %v446_v30, 0.0 }
 0x234   : > { %v436_v17 = vpop.f32.mrf.mxu1 }
 0x235   : > { %v437_v18 = vadd.f32 %v436_v17, %v399_v58  ;;  %v472_v37 = vpack.c.bf16 %v1182_v34, %v1174_v11  ;;  %487 = vperm.xlu0 %1011, %v1092_v4  }
 0x237   : > { %v443_v21 = vmax.f32 %v437_v18, 0.0 }
 0x239   : > { %v447_v22 = vadd.f32 %v443_v21, %v361_v19 }
 0x23b   : > { %v1178_v25 = vmax.f32 %v447_v22, 0.0 }
 0x23c   : > { %v438_v27 = vpop.f32.mrf.mxu1 }
 0x23d   : > { %v439_v29 = vadd.f32 %v438_v27, %v403_v60  ;;  %462 = vrot.lane.b32.xlu1 %v1178_v25, %s1034_s6  ;;  %1014 = vset.pattern.permute.xlu0 %v1036_v13 }
 0x23f   : > { %v444_v32 = vmax.f32 %v439_v29, 0.0 }
 0x241   : > { %v448_v33 = vadd.f32 %v444_v32, %v363_v31 }
 0x243   : > { %v1184_v35 = vmax.f32 %v448_v33, 0.0 }
 0x245   : > { %464 = vrot.lane.b32.xlu2 %v1184_v35, %s1034_s6  ;;  %460 = vrot.lane.b32.xlu1 %v1182_v34, %s1034_s6  ;;  %v473_v36 = vpack.c.bf16 %v1184_v35, %v1178_v25 }
 0x247   : > { %510 = vmatpush.bf16.msra.mxu2 %v473_v36 }
 0x24b   : > { %511 = vmatpush.bf16.msra.mxu2 %v472_v37 }
 0x24d   : > { %475 = vperm.xlu1 %1012, %v1101_v6   ;;  %483 = vperm.xlu2 %1010, %v1109_v9  }
 0x255   : > { %479 = vperm.xlu2 %1010, %v1114_v10   ;;  %1015 = vset.pattern.permute.xlu1 %v1036_v13 }
 0x25d   : > { %1013 = vset.pattern.permute.xlu2 %v1036_v13 }
 0x29f   : > { %v465_v40 = vpop.permute.xlu2 %464  ;;  %v459_v45 = vpop.permute.xlu0 %458 }
 0x2a0   : > { %v469_v42 = vmul.f32 %v867_v39, %v465_v40  ;;  %v466_v47 = vmul.f32 %v867_v39, %v459_v45 }
 0x2a7   : > { %v484_v57 = vpop.permute.xlu2 %483  ;;  %v488_v62 = vpop.permute.xlu0 %487 }
 0x2af   : > { %v463_v41 = vpop.permute.xlu1 %462  ;;  %v480_v61 = vpop.permute.xlu2 %479 }
 0x2b0   : > { %v468_v43 = vmul.f32 %v867_v39, %v463_v41 }
 0x2b2   : > { %v471_v44 = vpack.c.bf16 %v469_v42, %v468_v43 }
 0x2b4   : > { %512 = vmatpush.bf16.msra.mxu2 %v471_v44 }
 0x2b7   : > { %v461_v46 = vpop.permute.xlu1 %460 }
 0x2b8   : > { %v467_v48 = vmul.f32 %v867_v39, %v461_v46 }
 0x2ba   : > { %v470_v49 = vpack.c.bf16 %v467_v48, %v466_v47 }
 0x2bc   : > { %513 = vmatpush.bf16.msra.mxu2 %v470_v49 }
 0x2bf   : > { %911 = vmatmul.msk.bf16.vlgmr.msra.gmra.mxu2 %vm415_vm2, %v965_v50  ;;  %v476_v52 = vpop.permute.xlu1 %475 }
 0x2cf   : > { %912 = vmatmul.msk.bf16.gmra.mxu2 %vm415_vm2, %v966_v51 }
 0x342   : > { %v515_v53 = vpop.f32.mrf.mxu2 }
 0x343   : > { %v516_v54 = vadd.f32 %v515_v53, %v476_v52  ;;  %v1038_v52 = vmov 4  }
 0x345   : > { %v525_v55 = vmax.f32 %v516_v54, 0.0 }
 0x347   : > { %534 = vrot.lane.b32.xlu0 %v525_v55, %s1034_s6 }
 0x34a   : > { %v517_v56 = vpop.f32.mrf.mxu2 }
 0x34b   : > { %v518_v63 = vadd.f32 %v517_v56, %v480_v61 }
 0x34d   : > { %v526_v2 = vmax.f32 %v518_v63, 0.0  ;;  %v969_v63 = vld [vmem:[%s1297_s2 + $0x30] sm:$0xff] }
 0x34f   : > { %v548_v7 = vpack.c.bf16 %v526_v2, %v525_v55  ;;  %563 = vperm.xlu0 %1014, %v1092_v4  }
 0x352   : > { %v520_v58 = vpop.f32.mrf.mxu2 }
 0x353   : > { %v521_v59 = vadd.f32 %v520_v58, %v484_v57 }
 0x355   : > { %v527_v60 = vmax.f32 %v521_v59, 0.0 }
 0x357   : > { %538 = vrot.lane.b32.xlu1 %v527_v60, %s1034_s6  ;;  %1017 = vset.pattern.permute.xlu0 %v1038_v52 }
 0x35a   : > { %v522_v0 = vpop.f32.mrf.mxu2 }
 0x35b   : > { %v523_v1 = vadd.f32 %v522_v0, %v488_v62 }
 0x35d   : > { %v528_v3 = vmax.f32 %v523_v1, 0.0 }
 0x35f   : > { %540 = vrot.lane.b32.xlu2 %v528_v3, %s1034_s6  ;;  %536 = vrot.lane.b32.xlu1 %v526_v2, %s1034_s6  ;;  %v549_v5 = vpack.c.bf16 %v528_v3, %v527_v60 }
 0x361   : > { %586 = vmatpush.bf16.msra.mxu3 %v549_v5 }
 0x365   : > { %587 = vmatpush.bf16.msra.mxu3 %v548_v7 }
 0x367   : > { %551 = vperm.xlu1 %1015, %v1101_v6   ;;  %559 = vperm.xlu2 %1013, %v1109_v9  }
 0x36f   : > { %555 = vperm.xlu2 %1013, %v1114_v10   ;;  %1018 = vset.pattern.permute.xlu1 %v1038_v52 }
 0x377   : > { %1016 = vset.pattern.permute.xlu2 %v1038_v52 }
 0x3b9   : > { %v541_v14 = vpop.permute.xlu2 %540  ;;  %v535_v19 = vpop.permute.xlu0 %534 }
 0x3ba   : > { %v545_v16 = vmul.f32 %v867_v39, %v541_v14  ;;  %v542_v21 = vmul.f32 %v867_v39, %v535_v19 }
 0x3c1   : > { %v560_v32 = vpop.permute.xlu2 %559  ;;  %v564_v43 = vpop.permute.xlu0 %563 }
 0x3c9   : > { %v539_v15 = vpop.permute.xlu1 %538  ;;  %v556_v37 = vpop.permute.xlu2 %555 }
 0x3ca   : > { %v544_v17 = vmul.f32 %v867_v39, %v539_v15 }
 0x3cc   : > { %v547_v18 = vpack.c.bf16 %v545_v16, %v544_v17 }
 0x3ce   : > { %588 = vmatpush.bf16.msra.mxu3 %v547_v18 }
 0x3d1   : > { %v537_v20 = vpop.permute.xlu1 %536 }
 0x3d2   : > { %v543_v22 = vmul.f32 %v867_v39, %v537_v20 }
 0x3d4   : > { %v546_v23 = vpack.c.bf16 %v543_v22, %v542_v21 }
 0x3d6   : > { %589 = vmatpush.bf16.msra.mxu3 %v546_v23 }
 0x3d9   : > { %925 = vmatmul.msk.bf16.vlgmr.msra.gmra.mxu3 %vm415_vm2, %v967_v24  ;;  %v552_v27 = vpop.permute.xlu1 %551  ;;  %v1039_v24 = vmov 5  }
 0x3e9   : > { %926 = vmatmul.msk.bf16.gmra.mxu3 %vm415_vm2, %v968_v26 }
 0x45c   : > { %v591_v28 = vpop.f32.mrf.mxu3 }
 0x45d   : > { %v592_v29 = vadd.f32 %v591_v28, %v552_v27 }
 0x45f   : > { %v601_v30 = vmax.f32 %v592_v29, 0.0 }
 0x461   : > { %v605_v31 = vadd.f32 %v601_v30, %v1174_v11 }
 0x463   : > { %v1225_v33 = vmax.f32 %v605_v31, 0.0 }
 0x464   : > { %v593_v36 = vpop.f32.mrf.mxu3 }
 0x465   : > { %618 = vrot.lane.b32.xlu0 %v1225_v33, %s1037_s15  ;;  %v594_v40 = vadd.f32 %v593_v36, %v556_v37 }
 0x467   : > { %v602_v44 = vmax.f32 %v594_v40, 0.0 }
 0x469   : > { %v606_v47 = vadd.f32 %v602_v44, %v1182_v34 }
 0x46b   : > { %v1236_v50 = vmax.f32 %v606_v47, 0.0 }
 0x46c   : > { %v596_v38 = vpop.f32.mrf.mxu3 }
 0x46d   : > { %v597_v39 = vadd.f32 %v596_v38, %v560_v32  ;;  %v632_v34 = vpack.c.bf16 %v1236_v50, %v1225_v33  ;;  %647 = vperm.xlu0 %1017, %v1092_v4  }
 0x46f   : > { %v603_v41 = vmax.f32 %v597_v39, 0.0  ;;  %v971_v39 = vld [vmem:[%s1297_s2 + $0x40] sm:$0xff] }
 0x471   : > { %v607_v42 = vadd.f32 %v603_v41, %v1178_v25 }
 0x473   : > { %v1230_v45 = vmax.f32 %v607_v42, 0.0 }
 0x474   : > { %v598_v11 = vpop.f32.mrf.mxu3 }
 0x475   : > { %v599_v46 = vadd.f32 %v598_v11, %v564_v43  ;;  %622 = vrot.lane.b32.xlu1 %v1230_v45, %s1037_s15  ;;  %1020 = vset.pattern.permute.xlu0 %v1039_v24 }
 0x477   : > { %v604_v48 = vmax.f32 %v599_v46, 0.0 }
 0x479   : > { %v608_v49 = vadd.f32 %v604_v48, %v1184_v35  ;;  %v868_v35 = vsel %vm244_vm4, 1.0, %v1032_v12 }
 0x47b   : > { %v1238_v51 = vmax.f32 %v608_v49, 0.0 }
 0x47d   : > { %624 = vrot.lane.b32.xlu2 %v1238_v51, %s1037_s15  ;;  %620 = vrot.lane.b32.xlu1 %v1236_v50, %s1037_s15  ;;  %v633_v25 = vpack.c.bf16 %v1238_v51, %v1230_v45 }
 0x47f   : > { %670 = vmatpush.bf16.msrb.mxu1 %v633_v25 }
 0x483   : > { %671 = vmatpush.bf16.msrb.mxu1 %v632_v34 }
 0x485   : > { %635 = vperm.xlu1 %1018, %v1101_v6   ;;  %643 = vperm.xlu2 %1016, %v1109_v9  }
 0x48d   : > { %639 = vperm.xlu2 %1016, %v1114_v10   ;;  %1021 = vset.pattern.permute.xlu1 %v1039_v24 }
 0x495   : > { %1019 = vset.pattern.permute.xlu2 %v1039_v24 }
 0x4d7   : > { %v625_v53 = vpop.permute.xlu2 %624  ;;  %v619_v58 = vpop.permute.xlu0 %618 }
 0x4d8   : > { %v629_v55 = vmul.f32 %v868_v35, %v625_v53  ;;  %v626_v60 = vmul.f32 %v868_v35, %v619_v58 }
 0x4df   : > { %v644_v5 = vpop.permute.xlu2 %643  ;;  %v648_v16 = vpop.permute.xlu0 %647 }
 0x4e7   : > { %v623_v54 = vpop.permute.xlu1 %622  ;;  %v640_v15 = vpop.permute.xlu2 %639 }
 0x4e8   : > { %v628_v56 = vmul.f32 %v868_v35, %v623_v54 }
 0x4ea   : > { %v631_v57 = vpack.c.bf16 %v629_v55, %v628_v56 }
 0x4ec   : > { %672 = vmatpush.bf16.msrb.mxu1 %v631_v57 }
 0x4ef   : > { %v621_v59 = vpop.permute.xlu1 %620 }
 0x4f0   : > { %v627_v61 = vmul.f32 %v868_v35, %v621_v59 }
 0x4f2   : > { %v630_v62 = vpack.c.bf16 %v627_v61, %v626_v60 }
 0x4f4   : > { %673 = vmatpush.bf16.msrb.mxu1 %v630_v62 }
 0x4f7   : > { %939 = vmatmul.msk.bf16.vlgmr.msrb.gmra.mxu1 %vm415_vm2, %v969_v63  ;;  %v636_v12 = vpop.permute.xlu1 %635  ;;  %v775_v63 = vld [vmem:[%s1298_s3] sm:$0xf] }
 0x507   : > { %940 = vmatmul.msk.bf16.gmra.mxu1 %vm415_vm2, %v970_v8 }
 0x574   : > { %v675_v0 = vpop.f32.mrf.mxu1 }
 0x575   : > { %v676_v1 = vadd.f32 %v675_v0, %v636_v12 }
 0x577   : > { %v685_v2 = vmax.f32 %v676_v1, 0.0 }
 0x579   : > { %694 = vrot.lane.b32.xlu0 %v685_v2, %s1037_s15 }
 0x57c   : > { %v677_v3 = vpop.f32.mrf.mxu1 }
 0x57d   : > { %v678_v17 = vadd.f32 %v677_v3, %v640_v15 }
 0x57f   : > { %v686_v20 = vmax.f32 %v678_v17, 0.0 }
 0x581   : > { %v708_v23 = vpack.c.bf16 %v686_v20, %v685_v2  ;;  %723 = vperm.xlu0 %1020, %v1092_v4   ;;  %v972_v4 = vld [vmem:[%s1297_s2 + $0x48] sm:$0xff] }
 0x584   : > { %v680_v7 = vpop.f32.mrf.mxu1 }
 0x585   : > { %v681_v13 = vadd.f32 %v680_v7, %v644_v5 }
 0x587   : > { %v687_v14 = vmax.f32 %v681_v13, 0.0 }
 0x589   : > { %698 = vrot.lane.b32.xlu1 %v687_v14, %s1037_s15  ;;  %784 = vrot.lane.b32.xlu0 %v1101_v6, %s1041_s28 }
 0x58c   : > { %v682_v18 = vpop.f32.mrf.mxu1 }
 0x58d   : > { %v683_v19 = vadd.f32 %v682_v18, %v648_v16 }
 0x58f   : > { %v688_v21 = vmax.f32 %v683_v19, 0.0 }
 0x591   : > { %700 = vrot.lane.b32.xlu2 %v688_v21, %s1037_s15  ;;  %696 = vrot.lane.b32.xlu1 %v686_v20, %s1037_s15  ;;  %v709_v22 = vpack.c.bf16 %v688_v21, %v687_v14 }
 0x593   : > { %746 = vmatpush.bf16.msrb.mxu2 %v709_v22 }
 0x597   : > { %747 = vmatpush.bf16.msrb.mxu2 %v708_v23 }
 0x599   : > { %711 = vperm.xlu1 %1021, %v1101_v6   ;;  %719 = vperm.xlu2 %1019, %v1109_v9  }
 0x5a1   : > { %715 = vperm.xlu2 %1019, %v1114_v10  }
 0x5eb   : > { %v701_v26 = vpop.permute.xlu2 %700  ;;  %v695_v31 = vpop.permute.xlu0 %694 }
 0x5ec   : > { %v705_v28 = vmul.f32 %v868_v35, %v701_v26  ;;  %v702_v36 = vmul.f32 %v868_v35, %v695_v31 }
 0x5f3   : > { %v720_v9 = vpop.permute.xlu2 %719  ;;  %v724_v53 = vpop.permute.xlu0 %723 }
 0x5fb   : > { %v699_v27 = vpop.permute.xlu1 %698  ;;  %v716_v42 = vpop.permute.xlu2 %715 }
 0x5fc   : > { %v704_v29 = vmul.f32 %v868_v35, %v699_v27 }
 0x5fe   : > { %v707_v30 = vpack.c.bf16 %v705_v28, %v704_v29 }
 0x600   : > { %748 = vmatpush.bf16.msrb.mxu2 %v707_v30 }
 0x603   : > { %v697_v32 = vpop.permute.xlu1 %696 }
 0x604   : > { %v703_v37 = vmul.f32 %v868_v35, %v697_v32 }
 0x606   : > { %v706_v38 = vpack.c.bf16 %v703_v37, %v702_v36 }
 0x608   : > { %749 = vmatpush.bf16.msrb.mxu2 %v706_v38 }
 0x60b   : > { %953 = vmatmul.msk.bf16.vlgmr.msrb.gmra.mxu2 %vm415_vm2, %v971_v39  ;;  %v712_v10 = vpop.permute.xlu1 %711 }
 0x61b   : > { %954 = vmatmul.msk.bf16.gmra.mxu2 %vm415_vm2, %v972_v4 }
 0x68e   : > { %v751_v40 = vpop.f32.mrf.mxu2 }
 0x68f   : > { %v752_v41 = vadd.f32 %v751_v40, %v712_v10 }
 0x691   : > { %v761_v43 = vmax.f32 %v752_v41, 0.0 }
 0x693   : > { %v765_v46 = vadd.f32 %v761_v43, %v1225_v33 }
 0x695   : > { %v769_v49 = vmax.f32 %v765_v46, 0.0 }
 0x696   : > { %v753_v44 = vpop.f32.mrf.mxu2 }
 0x697   : > { %v754_v11 = vadd.f32 %v753_v44, %v716_v42 }
 0x699   : > { %v762_v47 = vmax.f32 %v754_v11, 0.0 }
 0x69b   : > { %v766_v48 = vadd.f32 %v762_v47, %v1236_v50 }
 0x69d   : > { %v770_v25 = vmax.f32 %v766_v48, 0.0 }
 0x69e   : > { %v756_v34 = vpop.f32.mrf.mxu2 }
 0x69f   : > { %v773_v52 = vpack.c.bf16 %v770_v25, %v769_v49  ;;  %v757_v35 = vadd.f32 %v756_v34, %v720_v9 }
 0x6a1   : > { %778 = vrot.lane.b32.xlu2 %v773_v52, %s1040_s27  ;;  %v763_v54 = vmax.f32 %v757_v35, 0.0 }
 0x6a3   : > { %v767_v57 = vadd.f32 %v763_v54, %v1230_v45  ;;  %v785_v45 = vpop.permute.xlu0 %784 }
 0x6a5   : > { %v771_v50 = vmax.f32 %v767_v57, 0.0 }
 0x6a6   : > { %v758_v55 = vpop.f32.mrf.mxu2 }
 0x6a7   : > { %v759_v56 = vadd.f32 %v758_v55, %v724_v53 }
 0x6a9   : > { %v764_v58 = vmax.f32 %v759_v56, 0.0 }
 0x6ab   : > { %v768_v33 = vadd.f32 %v764_v58, %v1238_v51 }
 0x6ad   : > { %v772_v59 = vmax.f32 %v768_v33, 0.0 }
 0x6af   : > { %v774_v60 = vpack.c.bf16 %v772_v59, %v771_v50 }
 0x6b1   : > { %780 = vrot.lane.b32.xlu1 %v774_v60, %s1040_s27 }
 0x6fb   : > { %v779_v62 = vpop.permute.xlu2 %778 }
 0x723   : > { %v781_v61 = vpop.permute.xlu1 %780 }
 0x724   : > { %796 = vmatpush.bf16.msrb.mxu3 %v781_v61 }
 0x728   : > { %797 = vmatpush.bf16.msrb.mxu3 %v779_v62 }
 0x72b   : > { %955 = vmatmul.msk.bf16.vlgmr.msrb.gmra.mxu3 %vm323_vm1, %v775_v63 }
 0x7ae   : > { %v799_v8 = vpop.f32.mrf.mxu3 }
 0x7af   : > { %v800_v6 = vadd.f32 %v799_v8, %v785_v45 }
 0x7b1   : > { %804 = vst.msk [vmem:[%s222_s8] sm:$0xff] %vm803_vm5, %v800_v6 }
 0x7b6   : > { %v801_v51 = vpop.f32.mrf.mxu3 }
 0x7b7 PF: > { %s15_s18 = sadd.s32 1, %s1028_s18  }
 0x7b8   : > { %p12_p4 = scmp.ge.s32.totalorder %s15_s18, 4  }
 0x7ba   :  { %14 = sbr.rel (!%p12_p4) target bundleno = 1 (0x1), region = 74 }

</bundles_post_ra>
